<compile_context>
chip_gen: v6e
topology: v6e:2x2x1
jax: 0.10.0
libtpu: 0.0.40
codegen_flags: <defaults>
</compile_context>

<pallas_src>
import jax
import jax.numpy as jnp
from jax import lax
from jax.experimental import pallas as pl
from jax.experimental.pallas import tpu as pltpu


def mf_forward_kernel(ids_ref, user_hi_ref, user_lo_ref,
                      item_hi_ref, item_lo_ref, out_ref):
    bm = ids_ref.shape[0]                 # batch tile
    n_users, F = user_hi_ref.shape
    n_items = item_hi_ref.shape[0]

    ids = ids_ref[...]                    # (bm, 3) int32, one vld
    u_ids = ids[:, 0:1]                   # (bm, 1)
    p_ids = ids[:, 1:2]
    n_ids = ids[:, 2:3]

    # One-hot selection matrices built on the VPU; bf16 is exact for 0/+-1.
    user_iota = lax.broadcasted_iota(jnp.int32, (bm, n_users), 1)
    item_iota = lax.broadcasted_iota(jnp.int32, (bm, n_items), 1)
    onehot_u = (user_iota == u_ids).astype(jnp.bfloat16)            # (bm, n_users)
    d_onehot = ((item_iota == p_ids).astype(jnp.bfloat16)
                - (item_iota == n_ids).astype(jnp.bfloat16))        # (bm, n_items), {-1,0,1}

    # MXU gathers: single-pass bf16 matmuls, f32 accumulation, hi + lo halves
    # reconstruct the original f32 table values to ~2^-16 relative error.
    u = (jnp.dot(onehot_u, user_hi_ref[...], preferred_element_type=jnp.float32)
         + jnp.dot(onehot_u, user_lo_ref[...], preferred_element_type=jnp.float32))
    d = (jnp.dot(d_onehot, item_hi_ref[...], preferred_element_type=jnp.float32)
         + jnp.dot(d_onehot, item_lo_ref[...], preferred_element_type=jnp.float32))

    prod = u * d                                                    # u * (p - n), f32

    # Lane-dense reduction: out[0, b] = sum_f prod[b, f] via a ones-row
    # NT matmul -> (1, bm) with batch on lanes (no masked (bm, 1) store).
    ones_row = jnp.ones((1, F), dtype=jnp.float32)
    out_ref[...] = lax.dot_general(
        ones_row, prod,
        dimension_numbers=(((1,), (1,)), ((), ())),
        preferred_element_type=jnp.float32)                         # (1, bm)


def _pick_bm(b_pad):
    # Prefer large batch tiles (amortize ~0.35us/grid-step, longer MXU bursts)
    # while keeping >= 2 grid steps when possible so the "parallel" batch axis
    # can shard across v7x's two TensorCores.
    for cand in (512, 256, 128):
        if b_pad % cand == 0 and b_pad // cand >= 2:
            return cand
    return b_pad  # single resident block (b_pad is always a multiple of 128)


def mf_forward(user, item_p, item_n, user_factors, item_factors, *, bm=None):
    B = int(user.shape[0])
    n_users, F = user_factors.shape
    n_items = item_factors.shape[0]

    # Guard: the one-hot MXU gather assumes both tables stay VMEM-resident.
    table_bytes = (n_users + n_items) * F * 4
    assert table_bytes <= 8 * 1024 * 1024, (
        "embedding tables too large for the VMEM-resident one-hot gather; "
        "use the HBM DMA row-gather path (see TODO at top of file)")

    # Pad the batch to a multiple of 128 so every (1, bm) output block is a
    # full-lane, unmasked store; pad ids with 0 (a valid row, result discarded).
    B_pad = ((B + 127) // 128) * 128
    if bm is None:
        bm = _pick_bm(B_pad)
    assert B_pad % bm == 0 and bm % 128 == 0

    ids = jnp.stack([user.astype(jnp.int32),
                     item_p.astype(jnp.int32),
                     item_n.astype(jnp.int32)], axis=1)              # (B, 3)
    if B_pad != B:
        ids = jnp.pad(ids, ((0, B_pad - B), (0, 0)))

    # Split each f32 table into bf16 hi + lo halves (exact to ~2^-16 relative).
    uf = user_factors.astype(jnp.float32)
    itf = item_factors.astype(jnp.float32)
    u_hi = uf.astype(jnp.bfloat16)
    u_lo = (uf - u_hi.astype(jnp.float32)).astype(jnp.bfloat16)
    i_hi = itf.astype(jnp.bfloat16)
    i_lo = (itf - i_hi.astype(jnp.float32)).astype(jnp.bfloat16)

    out = pl.pallas_call(
        mf_forward_kernel,
        out_shape=jax.ShapeDtypeStruct((1, B_pad), jnp.float32),
        grid_spec=pltpu.PrefetchScalarGridSpec(
            num_scalar_prefetch=0,
            grid=(B_pad // bm,),
            in_specs=[
                pl.BlockSpec((bm, 3), lambda i: (i, 0)),             # packed ids
                pl.BlockSpec((n_users, F), lambda i: (0, 0)),        # user table hi (resident)
                pl.BlockSpec((n_users, F), lambda i: (0, 0)),        # user table lo (resident)
                pl.BlockSpec((n_items, F), lambda i: (0, 0)),        # item table hi (resident)
                pl.BlockSpec((n_items, F), lambda i: (0, 0)),        # item table lo (resident)
            ],
            out_specs=pl.BlockSpec((1, bm), lambda i: (0, i)),       # lane-dense output
        ),
        compiler_params=pltpu.CompilerParams(
            dimension_semantics=("parallel",),   # batch tiles shard across TCs (v7x)
            vmem_limit_bytes=32 * 1024 * 1024,   # safe on v5e/v6e/v7x
        ),
    )(ids, u_hi, u_lo, i_hi, i_lo)

    return out[0, :B]  # (B,), matches PyTorch's .sum(1) output shape


if __name__ == "__main__":
    # Small, deterministic setup consistent with the module's __init__.
    n_users, n_items, n_factors = 32, 64, 256
    batch = 8

    key = jax.random.PRNGKey(0)
    k_u, k_i, k_bu, k_bp, k_bn = jax.random.split(key, 5)

    # torch.nn.Embedding default init: weights ~ N(0, 1), float32.
    user_factors = jax.random.normal(k_u, (n_users, n_factors), dtype=jnp.float32)
    item_factors = jax.random.normal(k_i, (n_items, n_factors), dtype=jnp.float32)

    user = jax.random.randint(k_bu, (batch,), 0, n_users, dtype=jnp.int32)
    item_p = jax.random.randint(k_bp, (batch,), 0, n_items, dtype=jnp.int32)
    item_n = jax.random.randint(k_bn, (batch,), 0, n_items, dtype=jnp.int32)

    out = mf_forward(user, item_p, item_n, user_factors, item_factors)
    out = jax.block_until_ready(out)

    # Pure-JAX reference for correctness.
    u = user_factors[user]
    p = item_factors[item_p]
    n = item_factors[item_n]
    ref = (u * p).sum(1) - (u * n).sum(1)

    assert out.shape == (batch,)
    # bf16 hi+lo split gather is exact to ~1e-5 relative; 1e-3 is generous.
    assert jnp.allclose(out, ref, atol=1e-3, rtol=1e-3), (out, ref)
    print("KERNEL_OK")
</pallas_src>

<mosaic_0001>
module attributes {stable_mosaic.version = 11 : i64} {
  func.func @mf_forward_kernel(%arg0: i32, %arg1: memref<128x3xi32, #tpu.memory_space<vmem>>, %arg2: memref<32x256xbf16, #tpu.memory_space<vmem>>, %arg3: memref<32x256xbf16, #tpu.memory_space<vmem>>, %arg4: memref<64x256xbf16, #tpu.memory_space<vmem>>, %arg5: memref<64x256xbf16, #tpu.memory_space<vmem>>, %arg6: memref<1x128xf32, #tpu.memory_space<vmem>>) attributes {dimension_semantics = [#tpu.dimension_semantics<parallel>], iteration_bounds = array<i64: 1>, scalar_prefetch = 0 : i64, scratch_operands = 0 : i64, tpu.core_type = #tpu.core_type<tc>, window_params = [{transform_indices = @transform_0, window_bounds = array<i64: 128, 3>}, {pipeline_mode = #tpu.pipeline_mode<synchronous>, transform_indices = @transform_1, window_bounds = array<i64: 32, 256>}, {pipeline_mode = #tpu.pipeline_mode<synchronous>, transform_indices = @transform_2, window_bounds = array<i64: 32, 256>}, {pipeline_mode = #tpu.pipeline_mode<synchronous>, transform_indices = @transform_3, window_bounds = array<i64: 64, 256>}, {pipeline_mode = #tpu.pipeline_mode<synchronous>, transform_indices = @transform_4, window_bounds = array<i64: 64, 256>}, {transform_indices = @transform_5, window_bounds = array<i64: 1, 128>}]} {
    %c0 = arith.constant 0 : index
    %c0_0 = arith.constant 0 : index
    %0 = vector.load %arg1[%c0, %c0_0] : memref<128x3xi32, #tpu.memory_space<vmem>>, vector<128x3xi32>
    %1 = vector.extract_strided_slice %0 {offsets = [0, 0], sizes = [128, 1], strides = [1, 1]} : vector<128x3xi32> to vector<128x1xi32>
    %2 = vector.extract_strided_slice %0 {offsets = [0, 1], sizes = [128, 1], strides = [1, 1]} : vector<128x3xi32> to vector<128x1xi32>
    %3 = vector.extract_strided_slice %0 {offsets = [0, 2], sizes = [128, 1], strides = [1, 1]} : vector<128x3xi32> to vector<128x1xi32>
    %4 = tpu.iota {dimensions = array<i32: 1>} : vector<128x32xi32>
    %5 = tpu.iota {dimensions = array<i32: 1>} : vector<128x64xi32>
    %6 = vector.broadcast %1 : vector<128x1xi32> to vector<128x32xi32>
    %7 = arith.cmpi eq, %4, %6 : vector<128x32xi32>
    %8 = arith.extui %7 : vector<128x32xi1> to vector<128x32xi32>
    %9 = arith.sitofp %8 : vector<128x32xi32> to vector<128x32xf32>
    %10 = arith.truncf %9 : vector<128x32xf32> to vector<128x32xbf16>
    %11 = vector.broadcast %2 : vector<128x1xi32> to vector<128x64xi32>
    %12 = arith.cmpi eq, %5, %11 : vector<128x64xi32>
    %13 = arith.extui %12 : vector<128x64xi1> to vector<128x64xi32>
    %14 = arith.sitofp %13 : vector<128x64xi32> to vector<128x64xf32>
    %15 = arith.truncf %14 : vector<128x64xf32> to vector<128x64xbf16>
    %16 = vector.broadcast %3 : vector<128x1xi32> to vector<128x64xi32>
    %17 = arith.cmpi eq, %5, %16 : vector<128x64xi32>
    %18 = arith.extui %17 : vector<128x64xi1> to vector<128x64xi32>
    %19 = arith.sitofp %18 : vector<128x64xi32> to vector<128x64xf32>
    %20 = arith.truncf %19 : vector<128x64xf32> to vector<128x64xbf16>
    %21 = arith.subf %15, %20 : vector<128x64xbf16>
    %c0_1 = arith.constant 0 : index
    %c0_2 = arith.constant 0 : index
    %22 = vector.load %arg2[%c0_1, %c0_2] : memref<32x256xbf16, #tpu.memory_space<vmem>>, vector<32x256xbf16>
    %cst = arith.constant dense<0.000000e+00> : vector<128x256xf32>
    %23 = tpu.matmul %10, %22, %cst {dimension_numbers = #tpu.dot_dimension_numbers<[1], [0], [0], [1], [0, 0, 1, 1], [], []>} : vector<128x32xbf16>, vector<32x256xbf16>, vector<128x256xf32> -> vector<128x256xf32>
    %c0_3 = arith.constant 0 : index
    %c0_4 = arith.constant 0 : index
    %24 = vector.load %arg3[%c0_3, %c0_4] : memref<32x256xbf16, #tpu.memory_space<vmem>>, vector<32x256xbf16>
    %cst_5 = arith.constant dense<0.000000e+00> : vector<128x256xf32>
    %25 = tpu.matmul %10, %24, %cst_5 {dimension_numbers = #tpu.dot_dimension_numbers<[1], [0], [0], [1], [0, 0, 1, 1], [], []>} : vector<128x32xbf16>, vector<32x256xbf16>, vector<128x256xf32> -> vector<128x256xf32>
    %26 = arith.addf %23, %25 : vector<128x256xf32>
    %c0_6 = arith.constant 0 : index
    %c0_7 = arith.constant 0 : index
    %27 = vector.load %arg4[%c0_6, %c0_7] : memref<64x256xbf16, #tpu.memory_space<vmem>>, vector<64x256xbf16>
    %cst_8 = arith.constant dense<0.000000e+00> : vector<128x256xf32>
    %28 = tpu.matmul %21, %27, %cst_8 {dimension_numbers = #tpu.dot_dimension_numbers<[1], [0], [0], [1], [0, 0, 1, 1], [], []>} : vector<128x64xbf16>, vector<64x256xbf16>, vector<128x256xf32> -> vector<128x256xf32>
    %c0_9 = arith.constant 0 : index
    %c0_10 = arith.constant 0 : index
    %29 = vector.load %arg5[%c0_9, %c0_10] : memref<64x256xbf16, #tpu.memory_space<vmem>>, vector<64x256xbf16>
    %cst_11 = arith.constant dense<0.000000e+00> : vector<128x256xf32>
    %30 = tpu.matmul %21, %29, %cst_11 {dimension_numbers = #tpu.dot_dimension_numbers<[1], [0], [0], [1], [0, 0, 1, 1], [], []>} : vector<128x64xbf16>, vector<64x256xbf16>, vector<128x256xf32> -> vector<128x256xf32>
    %31 = arith.addf %28, %30 : vector<128x256xf32>
    %32 = arith.mulf %26, %31 : vector<128x256xf32>
    %cst_12 = arith.constant 1.000000e+00 : f32
    %33 = vector.broadcast %cst_12 : f32 to vector<1x256xf32>
    %cst_13 = arith.constant dense<0.000000e+00> : vector<1x128xf32>
    %34 = tpu.matmul %33, %32, %cst_13 {dimension_numbers = #tpu.dot_dimension_numbers<[1], [1], [0], [0], [0, 0, 1, 0], [], []>} : vector<1x256xf32>, vector<128x256xf32>, vector<1x128xf32> -> vector<1x128xf32>
    %c0_14 = arith.constant 0 : index
    %c0_15 = arith.constant 0 : index
    %35 = vector.load %arg6[%c0_14, %c0_15] : memref<1x128xf32, #tpu.memory_space<vmem>>, vector<1x128xf32>
    tpu.vector_store %arg6[%c0_14, %c0_15], %34 {strides = array<i32>} : memref<1x128xf32, #tpu.memory_space<vmem>>, vector<1x128xf32>,
    return
  }
  func.func @transform_0(%arg0: i32) -> (i32, i32) {
    %c0_i32 = arith.constant 0 : i32
    %c0_i32_0 = arith.constant 0 : i32
    return %arg0, %c0_i32 : i32, i32
  }
  func.func @transform_1(%arg0: i32) -> (i32, i32) {
    %c0_i32 = arith.constant 0 : i32
    %c0_i32_0 = arith.constant 0 : i32
    %c0_i32_1 = arith.constant 0 : i32
    return %c0_i32, %c0_i32_0 : i32, i32
  }
  func.func @transform_2(%arg0: i32) -> (i32, i32) {
    %c0_i32 = arith.constant 0 : i32
    %c0_i32_0 = arith.constant 0 : i32
    %c0_i32_1 = arith.constant 0 : i32
    return %c0_i32, %c0_i32_0 : i32, i32
  }
  func.func @transform_3(%arg0: i32) -> (i32, i32) {
    %c0_i32 = arith.constant 0 : i32
    %c0_i32_0 = arith.constant 0 : i32
    %c0_i32_1 = arith.constant 0 : i32
    return %c0_i32, %c0_i32_0 : i32, i32
  }
  func.func @transform_4(%arg0: i32) -> (i32, i32) {
    %c0_i32 = arith.constant 0 : i32
    %c0_i32_0 = arith.constant 0 : i32
    %c0_i32_1 = arith.constant 0 : i32
    return %c0_i32, %c0_i32_0 : i32, i32
  }
  func.func @transform_5(%arg0: i32) -> (i32, i32) {
    %c0_i32 = arith.constant 0 : i32
    %c0_i32_0 = arith.constant 0 : i32
    return %c0_i32, %arg0 : i32, i32
  }
}

</mosaic_0001>

<bundles_post_ra>
// kernel: tpu_custom_call.1
= control target key start
LH: loop header
LB: loop body
LE: loop exit
PB: predicated region body
PF: predicated region fallthrough
CT: control target
= control target key end

     0   :  { %10 = vsyncpa [#allocation3], 0  ;;  %s1899_s0 = inlined_call_operand.vmem [shape: s32[128,3], index: 0, kind: input, shape index: {}]   ;;  %s1900_s1 = inlined_call_operand.hbm [shape: bf16[32,256], index: 1, kind: input, shape index: {}]   ;;  %s1901_s2 = inlined_call_operand.hbm [shape: bf16[32,256], index: 2, kind: input, shape index: {}]   ;;  %s1902_s3 = inlined_call_operand.vmem [shape: bf16[64,256], index: 3, kind: input, shape index: {}]   ;;  %s1903_s4 = inlined_call_operand.vmem [shape: bf16[64,256], index: 4, kind: input, shape index: {}]   ;;  %s1904_s5 = inlined_call_operand.hbm [shape: f32[1,128], index: 5, kind: output, shape index: {}]  }
   0x1   :  { %11 = vsyncpa [#allocation6], 0 }
   0x2   :  { %12 = vsyncpa [#allocation4], 0  ;;  %s1393_s18 = smov [#allocation2]  }
   0x3   :  { %s20_s19 = sshll.u32 %s1393_s18, 4  ;;  %s21_s19 = int_to_ptr.vmem [resolvable:$true] %s20_s19 }
   0x4   :  { %s1335_s20 = scalar_lea.vmem %s21_s19, 512  ;;  %p1340_p1 = scmp.lt.s32.totalorder %s21_s19, %s21_s19 }
   0x5   :  { %p1336_p0 = scmp.ne.s32.totalorder %s21_s19, %s1335_s20  ;;  %p1341_p2 = scmp.lt.s32.totalorder %s1335_s20, %s1335_s20 }
   0x7   :  { %p1342_p3 = por %p1341_p2, %p1340_p1 }
   0x9   :  { %p1343_p4 = pnand %p1342_p3, %p1336_p0 }
   0xb   :  { %1346 = shalt.err (!%p1343_p4)
}
   0xc   :  { %s1394_s21 = smov 128   ;;  %s1395_s22 = smov 8  }
   0xd   :  { %26 = dma.hbm_to_vmem [thread:$0]  %s1900_s1, 512, %s21_s19, [#allocation3], %s1394_s21, %s1394_s21, %s1395_s22  }
   0xe   :  { %s1396_s25 = smov [#allocation5]  }
   0xf   :  { %s32_s26 = sshll.u32 %s1396_s25, 4  ;;  %s33_s26 = int_to_ptr.vmem [resolvable:$true] %s32_s26 }
  0x10   :  { %s1355_s27 = scalar_lea.vmem %s33_s26, 512  ;;  %p1360_p6 = scmp.lt.s32.totalorder %s33_s26, %s33_s26 }
  0x11   :  { %p1356_p5 = scmp.ne.s32.totalorder %s33_s26, %s1355_s27  ;;  %p1361_p7 = scmp.lt.s32.totalorder %s1355_s27, %s1355_s27 }
  0x13   :  { %p1362_p8 = por %p1361_p7, %p1360_p6 }
  0x15   :  { %p1363_p9 = pnand %p1362_p8, %p1356_p5 }
  0x17   :  { %1366 = shalt.err (!%p1363_p9)
}
  0x18   :  { %38 = dma.hbm_to_vmem [thread:$0]  %s1901_s2, 512, %s33_s26, [#allocation6], %s1394_s21, %s1394_s21, %s1395_s22  }
  0x19   :  { %1387 = dma.done.wait [#allocation3], 512  }
  0x1a   :  { %1388 = vsyncadd [#allocation3], 4294966784 }
  0x1b   :  { %1389 = dma.done.wait [#allocation6], 512  }
  0x1c   :  { %1390 = vsyncadd [#allocation6], 4294966784  ;;  %v1397_v0 = vmov 0   ;;  %v1446_v1 = vld [vmem:[%s1899_s0 + $0x10] sm:$0xff]  ;;  %v50_v2 = vld [vmem:[%s1899_s0] sm:$0xff]  ;;  %v1398_v27 = vmov 1   ;;  %v66_v29 = vlaneseq }
  0x1d   :  { %1268 = vset.pattern.permute.xlu1 %v1397_v0  ;;  %1267 = vset.pattern.permute.xlu0 %v1397_v0  ;;  %v1455_v3 = vld [vmem:[%s1899_s0 + $0x18] sm:$0xff]  ;;  %v51_v4 = vld [vmem:[%s1899_s0 + $0x8] sm:$0xff]  ;;  %v1469_v6 = vld [vmem:[%s1899_s0 + $0x20] sm:$0xff]  ;;  %v1399_v28 = vmov 2   ;;  %vm416_vm2 = vcmask 261120   ;;  %v1400_v35 = vmov 0.0  }
  0x1e   :  { %473 = vmatprep.mubr.bf16.mxu0 %v1397_v0  ;;  %606 = vmatprep.mubr.bf16.mxu1 %v1397_v0  ;;  %v1463_v5 = vld [vmem:[%s1899_s0 + $0x28] sm:$0xff]  ;;  %v1291_v7 = vld [vmem:[#allocation5 + $0x14] ss:$8 sps:$4 sm:$0xff]   ;;  %v1295_v9 = vld [vmem:[#allocation5 + $0x10] ss:$8 sps:$4 sm:$0xff]   ;;  %v1527_v32 = vand.u32 127, %v66_v29 }
  0x1f   :  { %75 = vperm.xlu1 %1268, %v1446_v1   ;;  %69 = vperm.xlu0 %1267, %v50_v2   ;;  %v1293_v8 = vld [vmem:[#allocation2 + $0x14] ss:$8 sps:$4 sm:$0xff]   ;;  %v1296_v10 = vld [vmem:[#allocation2 + $0x10] ss:$8 sps:$4 sm:$0xff]   ;;  %v1297_v12 = vld [vmem:[#allocation5 + $0x4] ss:$8 sps:$4 sm:$0xff]  }
  0x20   :  { %v1474_v11 = vld [vmem:[%s1899_s0 + $0x38] sm:$0xff]  ;;  %453 = vmatprep.subr.bf16.mxu0 %v1291_v7  ;;  %v1299_v13 = vld [vmem:[#allocation2 + $0x4] ss:$8 sps:$4 sm:$0xff]   ;;  %v56_v14 = vld [vmem:[%s1899_s0 + $0x30] sm:$0xff]  ;;  %586 = vmatprep.subr.bf16.mxu1 %v1293_v8 }
  0x21   :  { %454 = vmatpush1.bf16.msra.mxu0 %v1295_v9  ;;  %v1301_v15 = vld [vmem:[#allocation5] ss:$8 sps:$4 sm:$0xff]   ;;  %587 = vmatpush1.bf16.msra.mxu1 %v1296_v10  ;;  %v1305_v17 = vld [vmem:[%s1903_s4 + $0x34] ss:$8 sps:$4 sm:$0xff]   ;;  %v1303_v38 = vld [vmem:[%s1903_s4 + $0x30] ss:$8 sps:$4 sm:$0xff]  }
  0x22   :  { %455 = vmatprep.subr.bf16.mxu0 %v1297_v12  ;;  %v1302_v16 = vld [vmem:[#allocation2] ss:$8 sps:$4 sm:$0xff]   ;;  %588 = vmatprep.subr.bf16.mxu1 %v1299_v13  ;;  %v1308_v20 = vld [vmem:[%s1902_s3 + $0x34] ss:$8 sps:$4 sm:$0xff]   ;;  %v1306_v39 = vld [vmem:[%s1902_s3 + $0x30] ss:$8 sps:$4 sm:$0xff]  }
  0x23   :  { %78 = vperm.xlu1 %1268, %v1455_v3   ;;  %72 = vperm.xlu0 %1267, %v51_v4   ;;  %v59_v18 = vld [vmem:[%s1899_s0 + $0x48] sm:$0xff]  ;;  %v1490_v19 = vld [vmem:[%s1899_s0 + $0x40] sm:$0xff]  ;;  %v61_v21 = vld [vmem:[%s1899_s0 + $0x58] sm:$0xff] }
  0x24   :  { %v60_v22 = vld [vmem:[%s1899_s0 + $0x50] sm:$0xff]  ;;  %v63_v23 = vld [vmem:[%s1899_s0 + $0x68] sm:$0xff]  ;;  %v62_v24 = vld [vmem:[%s1899_s0 + $0x60] sm:$0xff] }
  0x25   :  { %456 = vmatpush1.bf16.msra.mxu0 %v1301_v15  ;;  %589 = vmatpush1.bf16.msra.mxu1 %v1302_v16  ;;  %v65_v25 = vld [vmem:[%s1899_s0 + $0x78] sm:$0xff]  ;;  %v64_v26 = vld [vmem:[%s1899_s0 + $0x70] sm:$0xff]  ;;  %v1311_v42 = vld [vmem:[%s1903_s4 + $0x24] ss:$8 sps:$4 sm:$0xff]  }
  0x26   :  { %776 = vmatprep.subr.bf16.mxu0 %v1305_v17  ;;  %929 = vmatprep.subr.bf16.mxu1 %v1308_v20  ;;  %v1314_v43 = vld [vmem:[%s1902_s3 + $0x24] ss:$8 sps:$4 sm:$0xff]   ;;  %v1309_v44 = vld [vmem:[%s1903_s4 + $0x20] ss:$8 sps:$4 sm:$0xff]   ;;  %v1317_v46 = vld [vmem:[%s1903_s4 + $0x14] ss:$8 sps:$4 sm:$0xff]  }
  0x27   :  { %84 = vperm.xlu1 %1268, %v1463_v5   ;;  %81 = vperm.xlu0 %1267, %v1469_v6   ;;  %v1312_v45 = vld [vmem:[%s1902_s3 + $0x20] ss:$8 sps:$4 sm:$0xff]   ;;  %v1320_v47 = vld [vmem:[%s1902_s3 + $0x14] ss:$8 sps:$4 sm:$0xff]   ;;  %v1315_v53 = vld [vmem:[%s1903_s4 + $0x10] ss:$8 sps:$4 sm:$0xff]  }
  0x28   :  { %v1318_v54 = vld [vmem:[%s1902_s3 + $0x10] ss:$8 sps:$4 sm:$0xff]   ;;  %v1323_v56 = vld [vmem:[%s1903_s4 + $0x4] ss:$8 sps:$4 sm:$0xff]   ;;  %v1321_v58 = vld [vmem:[%s1903_s4] ss:$8 sps:$4 sm:$0xff]  }
  0x29   :  { %v1326_v57 = vld [vmem:[%s1902_s3 + $0x4] ss:$8 sps:$4 sm:$0xff]   ;;  %v1324_v59 = vld [vmem:[%s1902_s3] ss:$8 sps:$4 sm:$0xff]   ;;  %s1402_s3 = smov [#allocation7]  }
  0x2a   :  { %s1143_s4 = sshll.u32 %s1402_s3, 4  ;;  %s1144_s4 = int_to_ptr.vmem [resolvable:$true] %s1143_s4 }
  0x2b   :  { %90 = vperm.xlu1 %1268, %v1474_v11   ;;  %87 = vperm.xlu0 %1267, %v56_v14   ;;  %s1367_s0 = scalar_lea.vmem %s1144_s4, 16  ;;  %s1371_s12 = scalar_lea.vmem %s1144_s4, 32 }
  0x2c   :  { %p1368_p10 = scmp.ne.s32.totalorder %s1144_s4, %s1367_s0  ;;  %p1372_p11 = scmp.lt.s32.totalorder %s1144_s4, %s1144_s4 }
  0x2d   :  { %p1373_p12 = scmp.lt.s32.totalorder %s1371_s12, %s1367_s0 }
  0x2f   :  { %96 = vperm.xlu1 %1268, %v59_v18   ;;  %93 = vperm.xlu0 %1267, %v1490_v19   ;;  %p1374_p13 = por %p1373_p12, %p1372_p11 }
  0x31   :  { %p1375_p0 = pnand %p1374_p13, %p1368_p10 }
  0x33   :  { %102 = vperm.xlu1 %1268, %v61_v21   ;;  %99 = vperm.xlu0 %1267, %v60_v22  }
  0x37   :  { %108 = vperm.xlu1 %1268, %v63_v23   ;;  %105 = vperm.xlu0 %1267, %v62_v24  }
  0x3b   :  { %114 = vperm.xlu1 %1268, %v65_v25   ;;  %111 = vperm.xlu0 %1267, %v64_v26  }
  0x3f   :  { %1270 = vset.pattern.permute.xlu1 %v1398_v27  ;;  %1269 = vset.pattern.permute.xlu0 %v1398_v27 }
  0x40   :  { %176 = vperm.xlu1 %1270, %v51_v4   ;;  %173 = vperm.xlu0 %1269, %v50_v2  }
  0x44   :  { %1271 = vset.pattern.permute.xlu1 %v1399_v28  ;;  %1272 = vset.pattern.permute.xlu0 %v1399_v28 }
  0x45   :  { %277 = vperm.xlu1 %1271, %v50_v2   ;;  %280 = vperm.xlu0 %1272, %v51_v4  }
  0x49   :  { %1273 = vset.pattern.permute.xlu1 %v1398_v27  ;;  %283 = vperm.xlu0 %1272, %v1446_v1  }
  0x4a   :  { %179 = vperm.xlu1 %1273, %v1446_v1  }
  0x4d   :  { %292 = vperm.xlu0 %1272, %v1463_v5  }
  0x4e   :  { %182 = vperm.xlu1 %1273, %v1455_v3  }
  0x51   :  { %1277 = vset.pattern.permute.xlu0 %v1398_v27 }
  0x52   :  { %1274 = vset.pattern.permute.xlu1 %v1399_v28  ;;  %185 = vperm.xlu0 %1277, %v1469_v6  }
  0x53   :  { %286 = vperm.xlu1 %1274, %v1455_v3  }
  0x56   :  { %197 = vperm.xlu0 %1277, %v1490_v19  }
  0x57   :  { %1275 = vset.pattern.permute.xlu1 %v1398_v27 }
  0x58   :  { %188 = vperm.xlu1 %1275, %v1463_v5  }
  0x5a   :  { %1280 = vset.pattern.permute.xlu0 %v1399_v28 }
  0x5b   :  { %295 = vperm.xlu0 %1280, %v56_v14  }
  0x5c   :  { %1276 = vset.pattern.permute.xlu1 %v1399_v28 }
  0x5d   :  { %289 = vperm.xlu1 %1276, %v1469_v6  }
  0x5f   :  { %304 = vperm.xlu0 %1280, %v59_v18  }
  0x61   :  { %1278 = vset.pattern.permute.xlu1 %v1398_v27 }
  0x62   :  { %191 = vperm.xlu1 %1278, %v56_v14  }
  0x63   :  { %307 = vperm.xlu0 %1280, %v60_v22  }
  0x66   :  { %194 = vperm.xlu1 %1278, %v1474_v11  }
  0x67   :  { %1285 = vset.pattern.permute.xlu0 %v1398_v27 }
  0x68   :  { %209 = vperm.xlu0 %1285, %v62_v24  }
  0x6a   :  { %1279 = vset.pattern.permute.xlu1 %v1399_v28 }
  0x6b   :  { %298 = vperm.xlu1 %1279, %v1474_v11  }
  0x6c   :  { %1288 = vset.pattern.permute.xlu0 %v1399_v28 }
  0x6d   :  { %316 = vperm.xlu0 %1288, %v63_v23  }
  0x6f   :  { %1281 = vset.pattern.permute.xlu1 %v1398_v27 }
  0x70   :  { %200 = vperm.xlu1 %1281, %v59_v18  }
  0x71   :  { %319 = vperm.xlu0 %1288, %v64_v26  }
  0x74   :  { %1282 = vset.pattern.permute.xlu1 %v1399_v28 }
  0x75   :  { %301 = vperm.xlu1 %1282, %v1490_v19  }
  0x79   :  { %1283 = vset.pattern.permute.xlu1 %v1398_v27 }
  0x7a   :  { %203 = vperm.xlu1 %1283, %v60_v22  }
  0x7e   :  { %206 = vperm.xlu1 %1283, %v61_v21  }
  0x82   :  { %1284 = vset.pattern.permute.xlu1 %v1399_v28 }
  0x83   :  { %310 = vperm.xlu1 %1284, %v61_v21  }
  0x87   :  { %1286 = vset.pattern.permute.xlu1 %v1398_v27 }
  0x88   :  { %212 = vperm.xlu1 %1286, %v63_v23  }
  0x8c   :  { %1287 = vset.pattern.permute.xlu1 %v1399_v28 }
  0x8d   :  { %313 = vperm.xlu1 %1287, %v62_v24  }
  0x91   :  { %1289 = vset.pattern.permute.xlu1 %v1398_v27 }
  0x92   :  { %215 = vperm.xlu1 %1289, %v64_v26  }
  0x96   :  { %218 = vperm.xlu1 %1289, %v65_v25  }
  0x9a   :  { %v76_v30 = vpop.permute.xlu1 %75  ;;  %1290 = vset.pattern.permute.xlu1 %v1399_v28  ;;  %v70_v31 = vpop.permute.xlu0 %69 }
  0x9b   :  { %322 = vperm.xlu1 %1290, %v65_v25   ;;  %vm116_vm0 = vcmp.eq.s32.totalorder %v1527_v32, %v70_v31  ;;  %vm118_vm4 = vcmp.eq.s32.totalorder %v1527_v32, %v76_v30 }
  0x9c   :  { %v1153_v36 = vsel %vm116_vm0, 1.0, %v1400_v35  ;;  %v1155_v50 = vsel %vm118_vm4, 1.0, %v1400_v35 }
  0x9e   :  { %v79_v33 = vpop.permute.xlu1 %78  ;;  %v73_v34 = vpop.permute.xlu0 %72 }
  0x9f   :  { %vm117_vm1 = vcmp.eq.s32.totalorder %v1527_v32, %v73_v34  ;;  %vm119_vm3 = vcmp.eq.s32.totalorder %v1527_v32, %v79_v33 }
  0xa0   :  { %v1154_v37 = vsel %vm117_vm1, 1.0, %v1400_v35  ;;  %v1156_v48 = vsel %vm119_vm3, 1.0, %v1400_v35 }
  0xa1   :  { %v164_v40 = vpack.c.bf16 %v1154_v37, %v1153_v36  ;;  %v165_v52 = vpack.c.bf16 %v1156_v48, %v1155_v50 }
  0xa2   :  { %v85_v41 = vpop.permute.xlu1 %84  ;;  %v82_v51 = vpop.permute.xlu0 %81 }
  0xa3   :  { %1205 = vmatmul.mubr.msk.bf16.vlgmr.msra.gmra.mxu0 %vm416_vm2, %v164_v40  ;;  %1217 = vmatmul.mubr.msk.bf16.vlgmr.msra.gmra.mxu1 %vm416_vm2, %v164_v40  ;;  %vm121_vm5 = vcmp.eq.s32.totalorder %v1527_v32, %v85_v41  ;;  %vm120_vm6 = vcmp.eq.s32.totalorder %v1527_v32, %v82_v51 }
  0xa4   :  { %777 = vmatpush1.bf16.msra.mxu0 %v1303_v38  ;;  %930 = vmatpush1.bf16.msra.mxu1 %v1306_v39  ;;  %v1158_v60 = vsel %vm121_vm5, 1.0, %v1400_v35  ;;  %v1157_v61 = vsel %vm120_vm6, 1.0, %v1400_v35 }
  0xa5   :  { %483 = vmatprep.mubr.bf16.mxu0 %v1397_v0  ;;  %616 = vmatprep.mubr.bf16.mxu1 %v1397_v0  ;;  %v166_v1 = vpack.c.bf16 %v1158_v60, %v1157_v61 }
  0xa6   :  { %v91_v49 = vpop.permute.xlu1 %90  ;;  %778 = vmatprep.subr.bf16.mxu0 %v1311_v42  ;;  %931 = vmatprep.subr.bf16.mxu1 %v1314_v43  ;;  %v88_v62 = vpop.permute.xlu0 %87 }
  0xa7   :  { %vm123_vm7 = vcmp.eq.s32.totalorder %v1527_v32, %v91_v49  ;;  %vm122_vm8 = vcmp.eq.s32.totalorder %v1527_v32, %v88_v62 }
  0xa8   :  { %779 = vmatpush1.bf16.msra.mxu0 %v1309_v44  ;;  %932 = vmatpush1.bf16.msra.mxu1 %v1312_v45  ;;  %v1160_v4 = vsel %vm123_vm7, 1.0, %v1400_v35  ;;  %v1159_v5 = vsel %vm122_vm8, 1.0, %v1400_v35  ;;  %vm743_vm8 = vcmask 523264  }
  0xa9   :  { %780 = vmatprep.subr.bf16.mxu0 %v1317_v46  ;;  %933 = vmatprep.subr.bf16.mxu1 %v1320_v47  ;;  %v167_v7 = vpack.c.bf16 %v1160_v4, %v1159_v5 }
  0xaa   :  { %v97_v55 = vpop.permute.xlu1 %96  ;;  %v94_v3 = vpop.permute.xlu0 %93 }
  0xab   :  { %1206 = vmatmul.mubr.msk.bf16.gmra.mxu0 %vm416_vm2, %v165_v52  ;;  %1218 = vmatmul.mubr.msk.bf16.gmra.mxu1 %vm416_vm2, %v165_v52  ;;  %vm125_vm9 = vcmp.eq.s32.totalorder %v1527_v32, %v97_v55  ;;  %vm124_vm10 = vcmp.eq.s32.totalorder %v1527_v32, %v94_v3 }
  0xac   :  { %493 = vmatprep.mubr.bf16.mxu0 %v1397_v0  ;;  %626 = vmatprep.mubr.bf16.mxu1 %v1397_v0  ;;  %v1162_v10 = vsel %vm125_vm9, 1.0, %v1400_v35  ;;  %v1161_v11 = vsel %vm124_vm10, 1.0, %v1400_v35 }
  0xad   :  { %781 = vmatpush1.bf16.msra.mxu0 %v1315_v53  ;;  %934 = vmatpush1.bf16.msra.mxu1 %v1318_v54  ;;  %v168_v14 = vpack.c.bf16 %v1162_v10, %v1161_v11 }
  0xae   :  { %v103_v63 = vpop.permute.xlu1 %102  ;;  %782 = vmatprep.subr.bf16.mxu0 %v1323_v56  ;;  %935 = vmatprep.subr.bf16.mxu1 %v1326_v57  ;;  %v100_v8 = vpop.permute.xlu0 %99 }
  0xaf   :  { %vm127_vm11 = vcmp.eq.s32.totalorder %v1527_v32, %v103_v63  ;;  %vm126_vm12 = vcmp.eq.s32.totalorder %v1527_v32, %v100_v8 }
  0xb0   :  { %v1164_v16 = vsel %vm127_vm11, 1.0, %v1400_v35  ;;  %v1163_v17 = vsel %vm126_vm12, 1.0, %v1400_v35 }
  0xb1   :  { %783 = vmatpush1.bf16.msra.mxu0 %v1321_v58  ;;  %936 = vmatpush1.bf16.msra.mxu1 %v1324_v59  ;;  %v169_v19 = vpack.c.bf16 %v1164_v16, %v1163_v17 }
  0xb2   :  { %v109_v2 = vpop.permute.xlu1 %108  ;;  %v106_v12 = vpop.permute.xlu0 %105 }
  0xb3   :  { %1207 = vmatmul.mubr.msk.bf16.gmra.mxu0 %vm416_vm2, %v166_v1  ;;  %1219 = vmatmul.mubr.msk.bf16.gmra.mxu1 %vm416_vm2, %v166_v1  ;;  %vm129_vm13 = vcmp.eq.s32.totalorder %v1527_v32, %v109_v2  ;;  %vm128_vm14 = vcmp.eq.s32.totalorder %v1527_v32, %v106_v12 }
  0xb4   :  { %503 = vmatprep.mubr.bf16.mxu0 %v1397_v0  ;;  %636 = vmatprep.mubr.bf16.mxu1 %v1397_v0  ;;  %v1166_v22 = vsel %vm129_vm13, 1.0, %v1400_v35  ;;  %v1165_v23 = vsel %vm128_vm14, 1.0, %v1400_v35 }
  0xb5   :  { %v170_v25 = vpack.c.bf16 %v1166_v22, %v1165_v23 }
  0xb6   :  { %v115_v6 = vpop.permute.xlu1 %114  ;;  %v112_v18 = vpop.permute.xlu0 %111 }
  0xb7   :  { %vm131_vm15 = vcmp.eq.s32.totalorder %v1527_v32, %v115_v6  ;;  %vm130_vm0 = vcmp.eq.s32.totalorder %v1527_v32, %v112_v18 }
  0xb8   :  { %v1168_v28 = vsel %vm131_vm15, 1.0, %v1400_v35  ;;  %v1167_v29 = vsel %vm130_vm0, 1.0, %v1400_v35 }
  0xb9   :  { %v171_v33 = vpack.c.bf16 %v1168_v28, %v1167_v29 }
  0xbb   :  { %v177_v9 = vpop.permute.xlu1 %176  ;;  %1208 = vmatmul.mubr.msk.bf16.gmra.mxu0 %vm416_vm2, %v167_v7  ;;  %1220 = vmatmul.mubr.msk.bf16.gmra.mxu1 %vm416_vm2, %v167_v7  ;;  %v174_v21 = vpop.permute.xlu0 %173 }
  0xbc   :  { %513 = vmatprep.mubr.bf16.mxu0 %v1397_v0  ;;  %646 = vmatprep.mubr.bf16.mxu1 %v1397_v0  ;;  %vm221_vm4 = vcmp.eq.s32.totalorder %v1527_v32, %v177_v9  ;;  %vm220_vm5 = vcmp.eq.s32.totalorder %v1527_v32, %v174_v21 }
  0xbd   :  { %v1170_v37 = vsel %vm221_vm4, 1.0, %v1400_v35  ;;  %v1169_v38 = vsel %vm220_vm5, 1.0, %v1400_v35 }
  0xbe   :  { %v268_v42 = vpack.c.bf16 %v1170_v37, %v1169_v38 }
  0xc0   :  { %v278_v13 = vpop.permute.xlu1 %277  ;;  %v281_v26 = vpop.permute.xlu0 %280 }
  0xc1   :  { %vm324_vm1 = vcmp.eq.s32.totalorder %v1527_v32, %v278_v13  ;;  %vm325_vm3 = vcmp.eq.s32.totalorder %v1527_v32, %v281_v26 }
  0xc2   :  { %v1185_v34 = vsel %vm324_vm1, 1.0, %v1400_v35  ;;  %v1186_v36 = vsel %vm325_vm3, 1.0, %v1400_v35 }
  0xc3   :  { %1209 = vmatmul.mubr.msk.bf16.gmra.mxu0 %vm416_vm2, %v168_v14  ;;  %1221 = vmatmul.mubr.msk.bf16.gmra.mxu1 %vm416_vm2, %v168_v14  ;;  %v372_v40 = vpack.c.bf16 %v1186_v36, %v1185_v34 }
  0xc4   :  { %523 = vmatprep.mubr.bf16.mxu0 %v1397_v0  ;;  %656 = vmatprep.mubr.bf16.mxu1 %v1397_v0  ;;  %v284_v30 = vpop.permute.xlu0 %283 }
  0xc5   :  { %v1613_v15 = vpop.permute.xlu1 %179  ;;  %vm326_vm6 = vcmp.eq.s32.totalorder %v1527_v32, %v284_v30  ;;  %v380_v43 = vsub.bf16 %v268_v42, %v372_v40 }
  0xc6   :  { %v1187_v45 = vsel %vm326_vm6, 1.0, %v1400_v35  ;;  %vm222_vm9 = vcmp.eq.s32.totalorder %v1527_v32, %v1613_v15 }
  0xc7   :  { %v1171_v50 = vsel %vm222_vm9, 1.0, %v1400_v35 }
  0xc8   :  { %v293_v39 = vpop.permute.xlu0 %292 }
  0xc9   :  { %v183_v20 = vpop.permute.xlu1 %182  ;;  %vm329_vm10 = vcmp.eq.s32.totalorder %v1527_v32, %v293_v39 }
  0xca   :  { %v1190_v55 = vsel %vm329_vm10, 1.0, %v1400_v35 }
  0xcb   :  { %1210 = vmatmul.mubr.msk.bf16.gmra.mxu0 %vm416_vm2, %v169_v19  ;;  %1222 = vmatmul.mubr.msk.bf16.gmra.mxu1 %vm416_vm2, %v169_v19 }
  0xcc   :  { %533 = vmatprep.mubr.bf16.mxu0 %v1397_v0  ;;  %666 = vmatprep.mubr.bf16.mxu1 %v1397_v0 }
  0xcd   :  { %v186_v47 = vpop.permute.xlu0 %185 }
  0xce   :  { %v287_v24 = vpop.permute.xlu1 %286  ;;  %vm224_vm13 = vcmp.eq.s32.totalorder %v1527_v32, %v186_v47 }
  0xcf   :  { %vm327_vm7 = vcmp.eq.s32.totalorder %v1527_v32, %v287_v24  ;;  %v1173_v59 = vsel %vm224_vm13, 1.0, %v1400_v35 }
  0xd0   :  { %v1188_v46 = vsel %vm327_vm7, 1.0, %v1400_v35 }
  0xd1   :  { %v373_v49 = vpack.c.bf16 %v1188_v46, %v1187_v45  ;;  %v198_v51 = vpop.permute.xlu0 %197 }
  0xd2   :  { %vm228_vm5 = vcmp.eq.s32.totalorder %v1527_v32, %v198_v51 }
  0xd3   :  { %v189_v27 = vpop.permute.xlu1 %188  ;;  %1211 = vmatmul.mubr.msk.bf16.gmra.mxu0 %vm416_vm2, %v170_v25  ;;  %1223 = vmatmul.mubr.msk.bf16.gmra.mxu1 %vm416_vm2, %v170_v25  ;;  %v1177_v15 = vsel %vm228_vm5, 1.0, %v1400_v35 }
  0xd4   :  { %543 = vmatprep.mubr.bf16.mxu0 %v1397_v0  ;;  %676 = vmatprep.mubr.bf16.mxu1 %v1397_v0  ;;  %vm225_vm12 = vcmp.eq.s32.totalorder %v1527_v32, %v189_v27 }
  0xd5   :  { %v1174_v58 = vsel %vm225_vm12, 1.0, %v1400_v35 }
  0xd6   :  { %v296_v60 = vpop.permute.xlu0 %295  ;;  %v270_v62 = vpack.c.bf16 %v1174_v58, %v1173_v59 }
  0xd7   :  { %vm330_vm15 = vcmp.eq.s32.totalorder %v1527_v32, %v296_v60 }
  0xd8   :  { %v290_v31 = vpop.permute.xlu1 %289  ;;  %v1191_v3 = vsel %vm330_vm15, 1.0, %v1400_v35 }
  0xd9   :  { %vm328_vm11 = vcmp.eq.s32.totalorder %v1527_v32, %v290_v31 }
  0xda   :  { %v1189_v56 = vsel %vm328_vm11, 1.0, %v1400_v35  ;;  %v305_v5 = vpop.permute.xlu0 %304 }
  0xdb   :  { %1212 = vmatmul.mubr.msk.bf16.gmra.mxu0 %vm416_vm2, %v171_v33  ;;  %1224 = vmatmul.mubr.msk.bf16.gmra.mxu1 %vm416_vm2, %v171_v33  ;;  %vm223_vm2 = vcmp.eq.s32.totalorder %v1527_v32, %v183_v20  ;;  %v374_v61 = vpack.c.bf16 %v1190_v55, %v1189_v56  ;;  %vm333_vm4 = vcmp.eq.s32.totalorder %v1527_v32, %v305_v5 }
  0xdc   :  { %800 = vmatprep.mubr.bf16.mxu0 %v1397_v0  ;;  %953 = vmatprep.mubr.bf16.mxu1 %v1397_v0  ;;  %v1172_v48 = vsel %vm223_vm2, 1.0, %v1400_v35  ;;  %v1194_v13 = vsel %vm333_vm4, 1.0, %v1400_v35 }
  0xdd   :  { %v192_v41 = vpop.permute.xlu1 %191  ;;  %v269_v53 = vpack.c.bf16 %v1172_v48, %v1171_v50  ;;  %v382_v1 = vsub.bf16 %v270_v62, %v374_v61 }
  0xde   :  { %vm226_vm1 = vcmp.eq.s32.totalorder %v1527_v32, %v192_v41  ;;  %v308_v14 = vpop.permute.xlu0 %307 }
  0xdf   :  { %v381_v54 = vsub.bf16 %v269_v53, %v373_v49  ;;  %v1175_v8 = vsel %vm226_vm1, 1.0, %v1400_v35  ;;  %vm334_vm2 = vcmp.eq.s32.totalorder %v1527_v32, %v308_v14 }
  0xe0   :  { %v1195_v24 = vsel %vm334_vm2, 1.0, %v1400_v35 }
  0xe1   :  { %v195_v44 = vpop.permute.xlu1 %194 }
  0xe2   :  { %vm227_vm0 = vcmp.eq.s32.totalorder %v1527_v32, %v195_v44 }
  0xe3   :  { %1233 = vmatmul.mubr.msk.bf16.vlgmr.msra.gmra.mxu0 %vm743_vm8, %v380_v43  ;;  %1249 = vmatmul.mubr.msk.bf16.vlgmr.msra.gmra.mxu1 %vm743_vm8, %v380_v43  ;;  %v1176_v4 = vsel %vm227_vm0, 1.0, %v1400_v35  ;;  %v210_v19 = vpop.permute.xlu0 %209 }
  0xe4   :  { %810 = vmatprep.mubr.bf16.mxu0 %v1397_v0  ;;  %963 = vmatprep.mubr.bf16.mxu1 %v1397_v0  ;;  %v271_v9 = vpack.c.bf16 %v1176_v4, %v1175_v8  ;;  %vm232_vm13 = vcmp.eq.s32.totalorder %v1527_v32, %v210_v19 }
  0xe5   :  { %v1181_v37 = vsel %vm232_vm13, 1.0, %v1400_v35 }
  0xe6   :  { %v299_v52 = vpop.permute.xlu1 %298 }
  0xe7   :  { %vm331_vm14 = vcmp.eq.s32.totalorder %v1527_v32, %v299_v52 }
  0xe8   :  { %v1192_v2 = vsel %vm331_vm14, 1.0, %v1400_v35  ;;  %v317_v26 = vpop.permute.xlu0 %316 }
  0xe9   :  { %v375_v6 = vpack.c.bf16 %v1192_v2, %v1191_v3  ;;  %vm337_vm11 = vcmp.eq.s32.totalorder %v1527_v32, %v317_v26 }
  0xea   :  { %v1198_v34 = vsel %vm337_vm11, 1.0, %v1400_v35 }
  0xeb   :  { %v201_v57 = vpop.permute.xlu1 %200  ;;  %1234 = vmatmul.mubr.msk.bf16.gmra.mxu0 %vm743_vm8, %v381_v54  ;;  %1250 = vmatmul.mubr.msk.bf16.gmra.mxu1 %vm743_vm8, %v381_v54  ;;  %v383_v10 = vsub.bf16 %v271_v9, %v375_v6 }
  0xec   :  { %820 = vmatprep.mubr.bf16.mxu0 %v1397_v0  ;;  %973 = vmatprep.mubr.bf16.mxu1 %v1397_v0  ;;  %vm229_vm6 = vcmp.eq.s32.totalorder %v1527_v32, %v201_v57  ;;  %v320_v43 = vpop.permute.xlu0 %319 }
  0xed   :  { %v1178_v16 = vsel %vm229_vm6, 1.0, %v1400_v35  ;;  %vm338_vm1 = vcmp.eq.s32.totalorder %v1527_v32, %v320_v43 }
  0xee   :  { %v272_v20 = vpack.c.bf16 %v1178_v16, %v1177_v15  ;;  %v1199_v47 = vsel %vm338_vm1, 1.0, %v1400_v35 }
  0xf0   :  { %v302_v63 = vpop.permute.xlu1 %301 }
  0xf1   :  { %vm332_vm3 = vcmp.eq.s32.totalorder %v1527_v32, %v302_v63 }
  0xf2   :  { %v1193_v12 = vsel %vm332_vm3, 1.0, %v1400_v35 }
  0xf3   :  { %1235 = vmatmul.mubr.msk.bf16.gmra.mxu0 %vm743_vm8, %v382_v1  ;;  %1251 = vmatmul.mubr.msk.bf16.gmra.mxu1 %vm743_vm8, %v382_v1  ;;  %v376_v17 = vpack.c.bf16 %v1194_v13, %v1193_v12 }
  0xf4   :  { %830 = vmatprep.mubr.bf16.mxu0 %v1397_v0  ;;  %983 = vmatprep.mubr.bf16.mxu1 %v1397_v0 }
  0xf5   :  { %v204_v7 = vpop.permute.xlu1 %203  ;;  %v384_v21 = vsub.bf16 %v272_v20, %v376_v17 }
  0xf6   :  { %vm230_vm10 = vcmp.eq.s32.totalorder %v1527_v32, %v204_v7 }
  0xf7   :  { %v1179_v28 = vsel %vm230_vm10, 1.0, %v1400_v35 }
  0xf9   :  { %v207_v11 = vpop.permute.xlu1 %206 }
  0xfa   :  { %vm231_vm9 = vcmp.eq.s32.totalorder %v1527_v32, %v207_v11 }
  0xfb   :  { %1236 = vmatmul.mubr.msk.bf16.gmra.mxu0 %vm743_vm8, %v383_v10  ;;  %1252 = vmatmul.mubr.msk.bf16.gmra.mxu1 %vm743_vm8, %v383_v10  ;;  %v1180_v25 = vsel %vm231_vm9, 1.0, %v1400_v35 }
  0xfc   :  { %840 = vmatprep.mubr.bf16.mxu0 %v1397_v0  ;;  %993 = vmatprep.mubr.bf16.mxu1 %v1397_v0  ;;  %v273_v29 = vpack.c.bf16 %v1180_v25, %v1179_v28 }
  0xfe   :  { %v311_v18 = vpop.permute.xlu1 %310 }
  0xff   :  { %vm335_vm7 = vcmp.eq.s32.totalorder %v1527_v32, %v311_v18 }
 0x100   :  { %v1196_v22 = vsel %vm335_vm7, 1.0, %v1400_v35 }
 0x101   :  { %v377_v27 = vpack.c.bf16 %v1196_v22, %v1195_v24 }
 0x103   :  { %v213_v23 = vpop.permute.xlu1 %212  ;;  %1237 = vmatmul.mubr.msk.bf16.gmra.mxu0 %vm743_vm8, %v384_v21  ;;  %1253 = vmatmul.mubr.msk.bf16.gmra.mxu1 %vm743_vm8, %v384_v21  ;;  %v385_v31 = vsub.bf16 %v273_v29, %v377_v27 }
 0x104   :  { %850 = vmatprep.mubr.bf16.mxu0 %v1397_v0  ;;  %1003 = vmatprep.mubr.bf16.mxu1 %v1397_v0  ;;  %vm233_vm12 = vcmp.eq.s32.totalorder %v1527_v32, %v213_v23 }
 0x105   :  { %v1182_v36 = vsel %vm233_vm12, 1.0, %v1400_v35 }
 0x106   :  { %v274_v40 = vpack.c.bf16 %v1182_v36, %v1181_v37 }
 0x108   :  { %v314_v30 = vpop.permute.xlu1 %313 }
 0x109   :  { %vm336_vm14 = vcmp.eq.s32.totalorder %v1527_v32, %v314_v30 }
 0x10a   :  { %v1197_v33 = vsel %vm336_vm14, 1.0, %v1400_v35 }
 0x10b   :  { %1238 = vmatmul.mubr.msk.bf16.gmra.mxu0 %vm743_vm8, %v385_v31  ;;  %1254 = vmatmul.mubr.msk.bf16.gmra.mxu1 %vm743_vm8, %v385_v31  ;;  %v378_v38 = vpack.c.bf16 %v1198_v34, %v1197_v33 }
 0x10c   :  { %860 = vmatprep.mubr.bf16.mxu0 %v1397_v0  ;;  %1013 = vmatprep.mubr.bf16.mxu1 %v1397_v0 }
 0x10d   :  { %v216_v39 = vpop.permute.xlu1 %215  ;;  %v386_v41 = vsub.bf16 %v274_v40, %v378_v38 }
 0x10e   :  { %vm234_vm0 = vcmp.eq.s32.totalorder %v1527_v32, %v216_v39 }
 0x10f   :  { %v1183_v46 = vsel %vm234_vm0, 1.0, %v1400_v35 }
 0x111   :  { %v219_v42 = vpop.permute.xlu1 %218 }
 0x112   :  { %vm235_vm15 = vcmp.eq.s32.totalorder %v1527_v32, %v219_v42 }
 0x113   :  { %1239 = vmatmul.mubr.msk.bf16.gmra.mxu0 %vm743_vm8, %v386_v41  ;;  %1255 = vmatmul.mubr.msk.bf16.gmra.mxu1 %vm743_vm8, %v386_v41  ;;  %v1184_v44 = vsel %vm235_vm15, 1.0, %v1400_v35 }
 0x114   :  { %870 = vmatprep.mubr.bf16.mxu0 %v1397_v0  ;;  %1023 = vmatprep.mubr.bf16.mxu1 %v1397_v0  ;;  %v275_v49 = vpack.c.bf16 %v1184_v44, %v1183_v46 }
 0x116   :  { %v323_v45 = vpop.permute.xlu1 %322 }
 0x117   :  { %vm339_vm3 = vcmp.eq.s32.totalorder %v1527_v32, %v323_v45 }
 0x118   :  { %v1200_v48 = vsel %vm339_vm3, 1.0, %v1400_v35 }
 0x119   :  { %v379_v50 = vpack.c.bf16 %v1200_v48, %v1199_v47 }
 0x11b   :  { %v387_v51 = vsub.bf16 %v275_v49, %v379_v50 }
 0x11d   :  { %1240 = vmatmul.mubr.msk.bf16.gmra.mxu0 %vm743_vm8, %v387_v51  ;;  %1256 = vmatmul.mubr.msk.bf16.gmra.mxu1 %vm743_vm8, %v387_v51 }
 0x163   :  { %v475_v0 = vpop.f32.mrf.mxu0  ;;  %v608_v52 = vpop.f32.mrf.mxu1 }
 0x164   :  { %v1732_v53 = vadd.f32 %v608_v52, %v475_v0 }
 0x165   :  { %v477_v54 = vpop.f32.mrf.mxu0  ;;  %v610_v55 = vpop.f32.mrf.mxu1 }
 0x166   :  { %v1734_v32 = vadd.f32 %v610_v55, %v477_v54 }
 0x167   :  { %v479_v56 = vpop.f32.mrf.mxu0  ;;  %v612_v57 = vpop.f32.mrf.mxu1 }
 0x168   :  { %v1736_v58 = vadd.f32 %v612_v57, %v479_v56 }
 0x169   :  { %v481_v35 = vpop.f32.mrf.mxu0  ;;  %v614_v59 = vpop.f32.mrf.mxu1 }
 0x16a   :  { %v1738_v60 = vadd.f32 %v614_v59, %v481_v35 }
 0x16b   :  { %v485_v61 = vpop.f32.mrf.mxu0  ;;  %v618_v62 = vpop.f32.mrf.mxu1 }
 0x16c   :  { %v1740_v63 = vadd.f32 %v618_v62, %v485_v61 }
 0x16d   :  { %v487_v1 = vpop.f32.mrf.mxu0  ;;  %v620_v2 = vpop.f32.mrf.mxu1 }
 0x16e   :  { %v1742_v3 = vadd.f32 %v620_v2, %v487_v1 }
 0x16f   :  { %v489_v4 = vpop.f32.mrf.mxu0  ;;  %v622_v5 = vpop.f32.mrf.mxu1 }
 0x170   :  { %v1744_v6 = vadd.f32 %v622_v5, %v489_v4 }
 0x171   :  { %v491_v7 = vpop.f32.mrf.mxu0  ;;  %v624_v8 = vpop.f32.mrf.mxu1 }
 0x172   :  { %v1746_v9 = vadd.f32 %v624_v8, %v491_v7 }
 0x173   :  { %v495_v10 = vpop.f32.mrf.mxu0  ;;  %v628_v11 = vpop.f32.mrf.mxu1 }
 0x174   :  { %v1748_v12 = vadd.f32 %v628_v11, %v495_v10 }
 0x175   :  { %v497_v13 = vpop.f32.mrf.mxu0  ;;  %v630_v14 = vpop.f32.mrf.mxu1 }
 0x176   :  { %v1750_v15 = vadd.f32 %v630_v14, %v497_v13 }
 0x177   :  { %v499_v16 = vpop.f32.mrf.mxu0  ;;  %v632_v17 = vpop.f32.mrf.mxu1 }
 0x178   :  { %v1752_v18 = vadd.f32 %v632_v17, %v499_v16 }
 0x179   :  { %v501_v19 = vpop.f32.mrf.mxu0  ;;  %v634_v20 = vpop.f32.mrf.mxu1 }
 0x17a   :  { %v1754_v21 = vadd.f32 %v634_v20, %v501_v19 }
 0x17b   :  { %v505_v22 = vpop.f32.mrf.mxu0  ;;  %v638_v23 = vpop.f32.mrf.mxu1 }
 0x17c   :  { %v1756_v24 = vadd.f32 %v638_v23, %v505_v22 }
 0x17d   :  { %v507_v25 = vpop.f32.mrf.mxu0  ;;  %v640_v26 = vpop.f32.mrf.mxu1 }
 0x17e   :  { %v1758_v27 = vadd.f32 %v640_v26, %v507_v25 }
 0x17f   :  { %v509_v28 = vpop.f32.mrf.mxu0  ;;  %v642_v29 = vpop.f32.mrf.mxu1 }
 0x180   :  { %v1760_v30 = vadd.f32 %v642_v29, %v509_v28 }
 0x181   :  { %v511_v31 = vpop.f32.mrf.mxu0  ;;  %v644_v33 = vpop.f32.mrf.mxu1 }
 0x182   :  { %v1762_v34 = vadd.f32 %v644_v33, %v511_v31 }
 0x183   :  { %v515_v36 = vpop.f32.mrf.mxu0  ;;  %v648_v37 = vpop.f32.mrf.mxu1 }
 0x184   :  { %v1764_v38 = vadd.f32 %v648_v37, %v515_v36 }
 0x185   :  { %v517_v39 = vpop.f32.mrf.mxu0  ;;  %v650_v40 = vpop.f32.mrf.mxu1 }
 0x186   :  { %v1766_v41 = vadd.f32 %v650_v40, %v517_v39 }
 0x187   :  { %v519_v42 = vpop.f32.mrf.mxu0  ;;  %v652_v43 = vpop.f32.mrf.mxu1 }
 0x188   :  { %v1768_v44 = vadd.f32 %v652_v43, %v519_v42 }
 0x189   :  { %v521_v45 = vpop.f32.mrf.mxu0  ;;  %v654_v46 = vpop.f32.mrf.mxu1 }
 0x18a   :  { %v1770_v47 = vadd.f32 %v654_v46, %v521_v45  ;;  %v1905_v46 = vmov 1.0  }
 0x18b   :  { %v525_v48 = vpop.f32.mrf.mxu0  ;;  %v658_v49 = vpop.f32.mrf.mxu1  ;;  %1130 = vmatprep.mubr.f32.mxu0 %v1905_v46 }
 0x18c   :  { %v1772_v50 = vadd.f32 %v658_v49, %v525_v48 }
 0x18d   :  { %v527_v51 = vpop.f32.mrf.mxu0  ;;  %v660_v0 = vpop.f32.mrf.mxu1 }
 0x18e   :  { %v1774_v52 = vadd.f32 %v660_v0, %v527_v51 }
 0x18f   :  { %v529_v54 = vpop.f32.mrf.mxu0  ;;  %v662_v55 = vpop.f32.mrf.mxu1 }
 0x190   :  { %v1776_v56 = vadd.f32 %v662_v55, %v529_v54 }
 0x191   :  { %v531_v57 = vpop.f32.mrf.mxu0  ;;  %v664_v35 = vpop.f32.mrf.mxu1 }
 0x192   :  { %v1778_v59 = vadd.f32 %v664_v35, %v531_v57 }
 0x193   :  { %v535_v61 = vpop.f32.mrf.mxu0  ;;  %v668_v62 = vpop.f32.mrf.mxu1 }
 0x194   :  { %v1780_v1 = vadd.f32 %v668_v62, %v535_v61 }
 0x195   :  { %v537_v2 = vpop.f32.mrf.mxu0  ;;  %v670_v4 = vpop.f32.mrf.mxu1 }
 0x196   :  { %v1782_v5 = vadd.f32 %v670_v4, %v537_v2 }
 0x197   :  { %v539_v7 = vpop.f32.mrf.mxu0  ;;  %v672_v8 = vpop.f32.mrf.mxu1 }
 0x198   :  { %v1784_v10 = vadd.f32 %v672_v8, %v539_v7 }
 0x199   :  { %v541_v11 = vpop.f32.mrf.mxu0  ;;  %v674_v13 = vpop.f32.mrf.mxu1 }
 0x19a   :  { %v1786_v14 = vadd.f32 %v674_v13, %v541_v11 }
 0x19b   :  { %v545_v16 = vpop.f32.mrf.mxu0  ;;  %v678_v17 = vpop.f32.mrf.mxu1 }
 0x19c   :  { %v1788_v19 = vadd.f32 %v678_v17, %v545_v16 }
 0x19d   :  { %v547_v20 = vpop.f32.mrf.mxu0  ;;  %v680_v22 = vpop.f32.mrf.mxu1 }
 0x19e   :  { %v1790_v23 = vadd.f32 %v680_v22, %v547_v20 }
 0x19f   :  { %v549_v25 = vpop.f32.mrf.mxu0  ;;  %v682_v26 = vpop.f32.mrf.mxu1 }
 0x1a0   :  { %v1792_v28 = vadd.f32 %v682_v26, %v549_v25 }
 0x1a1   :  { %v551_v29 = vpop.f32.mrf.mxu0  ;;  %v684_v31 = vpop.f32.mrf.mxu1 }
 0x1a2   :  { %v1794_v33 = vadd.f32 %v684_v31, %v551_v29 }
 0x1a3   :  { %v802_v36 = vpop.f32.mrf.mxu0  ;;  %v955_v37 = vpop.f32.mrf.mxu1 }
 0x1a4   :  { %v956_v39 = vadd.f32 %v955_v37, %v802_v36 }
 0x1a5   :  { %v804_v40 = vpop.f32.mrf.mxu0  ;;  %v957_v42 = vpop.f32.mrf.mxu1 }
 0x1a6   :  { %v1797_v43 = vmul.f32 %v956_v39, %v1732_v53  ;;  %v958_v45 = vadd.f32 %v957_v42, %v804_v40 }
 0x1a7   :  { %v806_v48 = vpop.f32.mrf.mxu0  ;;  %v959_v49 = vpop.f32.mrf.mxu1 }
 0x1a8   :  { %1906 = vst [vmem:[#allocation11_spill] sm:$0xff] %v1797_v43  ;;  %v1801_v51 = vmul.f32 %v958_v45, %v1734_v32  ;;  %v960_v0 = vadd.f32 %v959_v49, %v806_v48 }
 0x1a9   :  { %v808_v54 = vpop.f32.mrf.mxu0  ;;  %v961_v55 = vpop.f32.mrf.mxu1 }
 0x1aa   :  { %1907 = vst [vmem:[#allocation12_spill] sm:$0xff] %v1801_v51  ;;  %v1804_v57 = vmul.f32 %v960_v0, %v1736_v58  ;;  %v962_v35 = vadd.f32 %v961_v55, %v808_v54 }
 0x1ab   :  { %v812_v61 = vpop.f32.mrf.mxu0  ;;  %v965_v62 = vpop.f32.mrf.mxu1 }
 0x1ac   :  { %1908 = vst [vmem:[#allocation13_spill] sm:$0xff] %v1804_v57  ;;  %v1807_v53 = vmul.f32 %v962_v35, %v1738_v60  ;;  %v966_v2 = vadd.f32 %v965_v62, %v812_v61 }
 0x1ad   :  { %v814_v4 = vpop.f32.mrf.mxu0  ;;  %v967_v7 = vpop.f32.mrf.mxu1 }
 0x1ae   :  { %1909 = vst [vmem:[#allocation14_spill] sm:$0xff] %v1807_v53  ;;  %v1810_v8 = vmul.f32 %v966_v2, %v1740_v63  ;;  %v968_v32 = vadd.f32 %v967_v7, %v814_v4 }
 0x1af   :  { %v816_v11 = vpop.f32.mrf.mxu0  ;;  %v969_v13 = vpop.f32.mrf.mxu1 }
 0x1b0   :  { %1910 = vst [vmem:[#allocation15_spill] sm:$0xff] %v1810_v8  ;;  %v1813_v16 = vmul.f32 %v968_v32, %v1742_v3  ;;  %v970_v58 = vadd.f32 %v969_v13, %v816_v11 }
 0x1b1   :  { %v818_v17 = vpop.f32.mrf.mxu0  ;;  %v971_v20 = vpop.f32.mrf.mxu1 }
 0x1b2   :  { %1911 = vst [vmem:[#allocation16_spill] sm:$0xff] %v1813_v16  ;;  %v1816_v22 = vmul.f32 %v970_v58, %v1744_v6  ;;  %v972_v60 = vadd.f32 %v971_v20, %v818_v17 }
 0x1b3   :  { %v822_v25 = vpop.f32.mrf.mxu0  ;;  %v975_v26 = vpop.f32.mrf.mxu1 }
 0x1b4   :  { %1912 = vst [vmem:[#allocation17_spill] sm:$0xff] %v1816_v22  ;;  %v1819_v29 = vmul.f32 %v972_v60, %v1746_v9  ;;  %v976_v63 = vadd.f32 %v975_v26, %v822_v25 }
 0x1b5   :  { %v824_v31 = vpop.f32.mrf.mxu0  ;;  %v977_v36 = vpop.f32.mrf.mxu1 }
 0x1b6   :  { %1913 = vst [vmem:[#allocation18_spill] sm:$0xff] %v1819_v29  ;;  %v1822_v37 = vmul.f32 %v976_v63, %v1748_v12  ;;  %v978_v3 = vadd.f32 %v977_v36, %v824_v31 }
 0x1b7   :  { %v826_v39 = vpop.f32.mrf.mxu0  ;;  %v979_v40 = vpop.f32.mrf.mxu1 }
 0x1b8   :  { %1914 = vst [vmem:[#allocation19_spill] sm:$0xff] %v1822_v37  ;;  %v1825_v42 = vmul.f32 %v978_v3, %v1750_v15  ;;  %v980_v6 = vadd.f32 %v979_v40, %v826_v39 }
 0x1b9   :  { %v828_v45 = vpop.f32.mrf.mxu0  ;;  %v981_v48 = vpop.f32.mrf.mxu1 }
 0x1ba   :  { %1915 = vst [vmem:[#allocation20_spill] sm:$0xff] %v1825_v42  ;;  %v1828_v49 = vmul.f32 %v980_v6, %v1752_v18  ;;  %v982_v9 = vadd.f32 %v981_v48, %v828_v45 }
 0x1bb   :  { %v832_v0 = vpop.f32.mrf.mxu0  ;;  %v985_v54 = vpop.f32.mrf.mxu1 }
 0x1bc   :  { %1916 = vst [vmem:[#allocation21_spill] sm:$0xff] %v1828_v49  ;;  %v1831_v55 = vmul.f32 %v982_v9, %v1754_v21  ;;  %v986_v12 = vadd.f32 %v985_v54, %v832_v0 }
 0x1bd   :  { %v834_v35 = vpop.f32.mrf.mxu0  ;;  %v987_v61 = vpop.f32.mrf.mxu1 }
 0x1be   :  { %1917 = vst [vmem:[#allocation22_spill] sm:$0xff] %v1831_v55  ;;  %v1834_v62 = vmul.f32 %v986_v12, %v1756_v24  ;;  %v988_v15 = vadd.f32 %v987_v61, %v834_v35 }
 0x1bf   :  { %v836_v2 = vpop.f32.mrf.mxu0  ;;  %v989_v4 = vpop.f32.mrf.mxu1 }
 0x1c0   :  { %1918 = vst [vmem:[#allocation23_spill] sm:$0xff] %v1834_v62  ;;  %v1837_v7 = vmul.f32 %v988_v15, %v1758_v27  ;;  %v990_v18 = vadd.f32 %v989_v4, %v836_v2 }
 0x1c1   :  { %v1839_v32 = vpop.f32.mrf.mxu0  ;;  %v1841_v11 = vpop.f32.mrf.mxu1 }
 0x1c2   :  { %v1844_v21 = vmul.f32 %v990_v18, %v1760_v30 }
 0x1c3   :  { %v1846_v13 = vpop.f32.mrf.mxu0  ;;  %v1848_v58 = vpop.f32.mrf.mxu1 }
 0x1c5   :  { %v1850_v24 = vpop.f32.mrf.mxu0  ;;  %v1852_v17 = vpop.f32.mrf.mxu1 }
 0x1c7   :  { %v1854_v20 = vpop.f32.mrf.mxu0  ;;  %v999_v27 = vpop.f32.mrf.mxu1 }
 0x1c9   :  { %v848_v60 = vpop.f32.mrf.mxu0  ;;  %v1001_v25 = vpop.f32.mrf.mxu1 }
 0x1cb   :  { %v852_v26 = vpop.f32.mrf.mxu0  ;;  %v1005_v63 = vpop.f32.mrf.mxu1 }
 0x1cd   :  { %v854_v31 = vpop.f32.mrf.mxu0  ;;  %v1007_v36 = vpop.f32.mrf.mxu1 }
 0x1cf   :  { %v856_v3 = vpop.f32.mrf.mxu0  ;;  %v1009_v30 = vpop.f32.mrf.mxu1 }
 0x1d1   :  { %v858_v39 = vpop.f32.mrf.mxu0  ;;  %v1011_v40 = vpop.f32.mrf.mxu1 }
 0x1d3   :  { %v862_v6 = vpop.f32.mrf.mxu0  ;;  %v1015_v45 = vpop.f32.mrf.mxu1 }
 0x1d5   :  { %v864_v48 = vpop.f32.mrf.mxu0  ;;  %v1017_v9 = vpop.f32.mrf.mxu1 }
 0x1d6   :  { %v1018_v62 = vadd.f32 %v1017_v9, %v864_v48 }
 0x1d7   :  { %v866_v0 = vpop.f32.mrf.mxu0  ;;  %v1019_v54 = vpop.f32.mrf.mxu1 }
 0x1d8   :  { %v1020_v49 = vadd.f32 %v1019_v54, %v866_v0 }
 0x1d9   :  { %v868_v12 = vpop.f32.mrf.mxu0  ;;  %v1021_v35 = vpop.f32.mrf.mxu1 }
 0x1da   :  { %v1022_v37 = vadd.f32 %v1021_v35, %v868_v12 }
 0x1dd   :  { %v872_v61 = vpop.f32.mrf.mxu0  ;;  %v1025_v15 = vpop.f32.mrf.mxu1 }
 0x1de   :  { %v1026_v22 = vadd.f32 %v1025_v15, %v872_v61 }
 0x1df   :  { %v874_v2 = vpop.f32.mrf.mxu0  ;;  %v1027_v4 = vpop.f32.mrf.mxu1 }
 0x1e0   :  { %v1028_v53 = vadd.f32 %v1027_v4, %v874_v2  ;;  %v1062_v55 = vmul.f32 %v1026_v22, %v1788_v19  ;;  %v1006_v19 = vadd.f32 %v1005_v63, %v852_v26 }
 0x1e1   :  { %v876_v18 = vpop.f32.mrf.mxu0  ;;  %v1029_v46 = vpop.f32.mrf.mxu1 }
 0x1e2   :  { %v1030_v43 = vadd.f32 %v1029_v46, %v876_v18  ;;  %v1063_v42 = vmul.f32 %v1028_v53, %v1790_v23  ;;  %v1061_v46 = vmul.f32 %v1022_v37, %v1786_v14  ;;  %v1010_v23 = vadd.f32 %v1009_v30, %v856_v3 }
 0x1e3   :  { %v878_v51 = vpop.f32.mrf.mxu0  ;;  %v1031_v57 = vpop.f32.mrf.mxu1  ;;  %v1008_v53 = vadd.f32 %v1007_v36, %v854_v31 }
 0x1e4   :  { %v1032_v8 = vadd.f32 %v1031_v57, %v878_v51  ;;  %v1064_v29 = vmul.f32 %v1030_v43, %v1792_v28  ;;  %v1016_v51 = vadd.f32 %v1015_v45, %v862_v6  ;;  %v1012_v57 = vadd.f32 %v1011_v40, %v858_v39 }
 0x1e5   :  { %v1059_v28 = vmul.f32 %v1018_v62, %v1782_v5  ;;  %v1056_v14 = vmul.f32 %v1010_v23, %v1776_v56  ;;  %v1055_v22 = vmul.f32 %v1008_v53, %v1774_v52  ;;  %v1000_v5 = vadd.f32 %v999_v27, %v1854_v20  ;;  %v1924_v62 = vld [vmem:[#allocation18_spill] sm:$0xff] }
 0x1e6   :  { %v1065_v16 = vmul.f32 %v1032_v8, %v1794_v33  ;;  %v1060_v33 = vmul.f32 %v1020_v49, %v1784_v10  ;;  %v1058_v43 = vmul.f32 %v1016_v51, %v1780_v1  ;;  %v1057_v8 = vmul.f32 %v1012_v57, %v1778_v59  ;;  %v1921_v49 = vld [vmem:[#allocation21_spill] sm:$0xff] }
 0x1e7   :  { %v1054_v10 = vmul.f32 %v1006_v19, %v1772_v50  ;;  %v998_v1 = vadd.f32 %v1852_v17, %v1850_v24  ;;  %v996_v59 = vadd.f32 %v1848_v58, %v1846_v13  ;;  %v1052_v56 = vmul.f32 %v1000_v5, %v1768_v44  ;;  %v1920_v44 = vld [vmem:[#allocation22_spill] sm:$0xff]  ;;  %v1931_v13 = vld [vmem:[#allocation11_spill] sm:$0xff] }
 0x1e8   :  { %1066 = vmatprep.subr.mxu0 %v1065_v16  ;;  %v1002_v16 = vadd.f32 %v1001_v25, %v848_v60  ;;  %v992_v52 = vadd.f32 %v1841_v11, %v1839_v32  ;;  %v1927_v32 = vld [vmem:[#allocation15_spill] sm:$0xff]  ;;  %v1928_v11 = vld [vmem:[#allocation14_spill] sm:$0xff]  ;;  %v1932_v58 = vmov 1.0  }
 0x1e9   :  { %1067 = vmatpush1.xpose.msra.mxu0 %v1064_v29  ;;  %v1051_v37 = vmul.f32 %v998_v1, %v1766_v41  ;;  %v1050_v50 = vmul.f32 %v996_v59, %v1764_v38  ;;  %v1923_v41 = vld [vmem:[#allocation19_spill] sm:$0xff]  ;;  %v1925_v38 = vld [vmem:[#allocation17_spill] sm:$0xff] }
 0x1ea   :  { %1068 = vmatprep.subr.mxu0 %v1063_v42  ;;  %v1053_v29 = vmul.f32 %v1002_v16, %v1770_v47  ;;  %v1049_v42 = vmul.f32 %v992_v52, %v1762_v34  ;;  %v1919_v47 = vld [vmem:[#allocation23_spill] sm:$0xff]  ;;  %v1926_v34 = vld [vmem:[#allocation16_spill] sm:$0xff] }
 0x1ed   :  { %1069 = vmatpush1.xpose.msra.mxu0 %v1062_v55  ;;  %v1922_v55 = vld [vmem:[#allocation20_spill] sm:$0xff] }
 0x1ee   :  { %1070 = vmatprep.subr.mxu0 %v1061_v46 }
 0x1f1   :  { %1071 = vmatpush1.xpose.msra.mxu0 %v1060_v33 }
 0x1f2   :  { %1072 = vmatprep.subr.mxu0 %v1059_v28 }
 0x1f5   :  { %1073 = vmatpush1.xpose.msra.mxu0 %v1058_v43 }
 0x1f6   :  { %1074 = vmatprep.subr.mxu0 %v1057_v8 }
 0x1f9   :  { %1075 = vmatpush1.xpose.msra.mxu0 %v1056_v14 }
 0x1fa   :  { %1076 = vmatprep.subr.mxu0 %v1055_v22 }
 0x1fd   :  { %1077 = vmatpush1.xpose.msra.mxu0 %v1054_v10 }
 0x1fe   :  { %1078 = vmatprep.subr.mxu0 %v1053_v29 }
 0x201   :  { %1079 = vmatpush1.xpose.msra.mxu0 %v1052_v56 }
 0x202   :  { %1080 = vmatprep.subr.mxu0 %v1051_v37 }
 0x205   :  { %1081 = vmatpush1.xpose.msra.mxu0 %v1050_v50 }
 0x206   :  { %1082 = vmatprep.subr.mxu0 %v1049_v42 }
 0x209   :  { %1083 = vmatpush1.xpose.msra.mxu0 %v1844_v21  ;;  %v1930_v21 = vld [vmem:[#allocation12_spill] sm:$0xff] }
 0x20a   :  { %1084 = vmatprep.subr.mxu0 %v1837_v7  ;;  %v1929_v7 = vld [vmem:[#allocation13_spill] sm:$0xff] }
 0x20d   :  { %1085 = vmatpush1.xpose.msra.mxu0 %v1919_v47 }
 0x20e   :  { %1086 = vmatprep.subr.mxu0 %v1920_v44 }
 0x211   :  { %1087 = vmatpush1.xpose.msra.mxu0 %v1921_v49 }
 0x212   :  { %1088 = vmatprep.subr.mxu0 %v1922_v55 }
 0x215   :  { %1089 = vmatpush1.xpose.msra.mxu0 %v1923_v41 }
 0x216   :  { %1090 = vmatprep.subr.mxu0 %v1924_v62 }
 0x219   :  { %1091 = vmatpush1.xpose.msra.mxu0 %v1925_v38 }
 0x21a   :  { %1092 = vmatprep.subr.mxu0 %v1926_v34 }
 0x21d   :  { %1093 = vmatpush1.xpose.msra.mxu0 %v1927_v32 }
 0x21e   :  { %1094 = vmatprep.subr.mxu0 %v1928_v11 }
 0x221   :  { %1095 = vmatpush1.xpose.msra.mxu0 %v1929_v7 }
 0x222   :  { %1096 = vmatprep.subr.mxu0 %v1930_v21 }
 0x225   :  { %1097 = vmatpush1.xpose.msra.mxu0 %v1931_v13 }
 0x228   :  { %1131 = vmatmul.mubr.f32.vlgmr.msra.gmra.mxu0 %v1932_v58 }
 0x2e8   :  { %v1132_v24 = vpop.f32.mrf.mxu0 }
 0x2e9   :  { %1136 = vst [vmem:[#allocation7] sm:$0x1] %v1132_v24 }
 0x2ea   :  { %v1134_v17 = vpop.f32.mrf.mxu0 }
 0x2eb   :  { %1378 = shalt.err (!%p1375_p0)
}
 0x2ec   :  { %1146 = dma.vmem_to_hbm [thread:$0]  %s1144_s4, 16, %s1904_s5, [#allocation4]  }
 0x2ed   :  { %1391 = dma.done.wait [#allocation4], 16  }
 0x2ee   :  { %1392 = vsyncadd [#allocation4], 4294967280 }
 0x2ef   :  { %1150 = vsyncpa [#allocation3], 1 }
 0x2f0   :  { %1151 = vsyncpa [#allocation6], 1 }
 0x2f1   :  { %1152 = vsyncpa [#allocation4], 1 }

</bundles_post_ra>
